<compile_context>
chip_gen: v6e
topology: v6e:2x2x1
jax: 0.10.0
libtpu: 0.0.40
codegen_flags: <defaults>
</compile_context>

<pallas_src>
import numpy as np

import jax
import jax.numpy as jnp
from jax.experimental import pallas as pl
from jax.experimental.pallas import tpu as pltpu


_LANE = 128
_SUBLANE = 8
_VMEM_TILE_BUDGET = 16 * 1024 * 1024   # shrink tile_b until the estimate fits this
_VMEM_LIMIT_CAP = 48 * 1024 * 1024     # stays under v7x's 64 MiB physical VMEM


def _round_up(x: int, m: int) -> int:
    return (x + m - 1) // m * m


# --------------------------------------------------------------------------- #
# Kernel
# --------------------------------------------------------------------------- #
def _make_mlp_kernel(num_layers: int, rows_used, param_dtype):
    """MLP kernel: Linear(+bias) layers with ReLU between them (not after last).

    Ref layout:
      refs[0]              : (tile_b, context_dim)      context rows (f32)
      refs[1 : 1+L]        : (rows_i, out_pad_i)        layer i: rows [0:in_i]=W (in,out),
                                                        row rows_used[i]=bias, rest zero
      refs[1+L]            : (tile_b, out_pad_last)     lane-dense output
    """

    def kernel(*refs):
        c_ref = refs[0]
        w_refs = refs[1:1 + num_layers]
        out_ref = refs[1 + num_layers]

        x = c_ref[...].astype(jnp.float32)
        for i in range(num_layers):
            ru = rows_used[i]
            w = w_refs[i][0:ru, :]                  # (ru, out_pad_i), param_dtype
            b = w_refs[i][ru:ru + 1, :]             # (1, out_pad_i) bias row
            # bf16 x bf16 -> f32 accumulation on the MXU; bias/ReLU stay f32.
            x = jnp.dot(x.astype(param_dtype), w,
                        preferred_element_type=jnp.float32) + b.astype(jnp.float32)
            if i < num_layers - 1:
                x = jnp.maximum(x, 0.0)             # ReLU between layers only
        out_ref[...] = x.astype(out_ref.dtype)

    return kernel


# --------------------------------------------------------------------------- #
# One-time parameter packing (host side, numpy -> no per-call XLA scatter ops)
# --------------------------------------------------------------------------- #
def prepare_context_processor(weights, biases, *, param_dtype=jnp.bfloat16):
    """Packs each layer into its own zero-padded (rows_i, out_pad_i) block.

    weights[i]: (in_i, out_i) (i.e. PyTorch W.T), biases[i]: (out_i,).
    For layer 0 the used row count is context_dim; for layer i>0 it equals the
    previous layer's padded output width (extra rows are zero, so the padded
    activation lanes stay inert). The bias lives in row `rows_used[i]`.
    """
    assert len(weights) == len(biases) and len(weights) >= 1
    context_dim = int(weights[0].shape[0])

    packed, rows_used, out_pads = [], [], []
    prev_out_pad = None
    for i, (w, b) in enumerate(zip(weights, biases)):
        in_d, out_d = int(w.shape[0]), int(w.shape[1])
        out_pad = _round_up(out_d, _LANE)
        ru = context_dim if i == 0 else prev_out_pad
        assert in_d <= ru, (in_d, ru)
        rows = _round_up(ru + 1, _SUBLANE)

        buf = np.zeros((rows, out_pad), dtype=np.float32)
        buf[:in_d, :out_d] = np.asarray(w, dtype=np.float32)
        buf[ru, :out_d] = np.asarray(b, dtype=np.float32)

        packed.append(jnp.asarray(buf).astype(param_dtype))
        rows_used.append(ru)
        out_pads.append(out_pad)
        prev_out_pad = out_pad

    return {
        "packed": tuple(packed),
        "rows_used": tuple(rows_used),
        "out_pads": tuple(out_pads),
        "context_dim": context_dim,
        "out_channels": int(weights[-1].shape[1]),
        "param_dtype": param_dtype,
    }


# --------------------------------------------------------------------------- #
# Forward wrapper
# --------------------------------------------------------------------------- #
def context_processor_forward(c, params, *, row_tile: int = 512):
    """Runs the ContextProcessor MLP in one pallas_call.

    Args:
      c: (B, context_dim) context vectors.
      params: output of prepare_context_processor().
    Returns:
      (B, out_channels) per-channel bias, same dtype as c.
    """
    assert c.ndim == 2
    B, context_dim = c.shape
    assert context_dim == params["context_dim"]
    assert row_tile >= _SUBLANE and row_tile % _SUBLANE == 0

    packed = params["packed"]
    rows_used = params["rows_used"]
    out_pads = params["out_pads"]
    out_channels = params["out_channels"]
    param_dtype = params["param_dtype"]
    num_layers = len(packed)
    out_pad_final = out_pads[-1]

    itemsize = jnp.dtype(c.dtype).itemsize
    param_bytes = sum(int(p.size) * jnp.dtype(param_dtype).itemsize for p in packed)

    # ---- batch tiling: only the batch dim of the context ever gets padded ----
    b8 = _round_up(B, _SUBLANE)
    grid = pl.cdiv(b8, row_tile)
    if b8 >= 2 * _SUBLANE:
        grid = max(grid, 2)            # v7x: give the second TensorCore a grid step
    tile_b = _round_up(pl.cdiv(b8, grid), _SUBLANE)

    def vmem_estimate(tb: int) -> int:
        max_w = max([context_dim] + list(out_pads))
        act = 3 * tb * max_w * 4                       # f32 activation headroom
        return (2 * tb * context_dim * itemsize        # context, double-buffered
                + param_bytes                          # params, single-buffered
                + 2 * tb * out_pad_final * itemsize    # output, double-buffered
                + act)

    while tile_b > _SUBLANE and vmem_estimate(tile_b) > _VMEM_TILE_BUDGET:
        tile_b = _round_up(tile_b // 2, _SUBLANE)
    grid = pl.cdiv(b8, tile_b)
    b_pad = grid * tile_b

    c_in = c if b_pad == B else jnp.pad(c, ((0, b_pad - B), (0, 0)))

    vmem_limit = int(min(max(4 * vmem_estimate(tile_b), 16 * 1024 * 1024),
                         _VMEM_LIMIT_CAP))

    kernel = _make_mlp_kernel(num_layers, rows_used, param_dtype)

    # CostEstimate must reflect the padded work actually executed.
    flops = 2 * b_pad * sum(ru * op for ru, op in zip(rows_used, out_pads))
    bytes_accessed = (b_pad * context_dim * itemsize + param_bytes
                      + b_pad * out_pad_final * itemsize)

    def run(param_pipeline_mode):
        in_specs = [pl.BlockSpec((tile_b, context_dim), lambda i: (i, 0))]
        for p in packed:
            if param_pipeline_mode is None:
                spec = pl.BlockSpec(p.shape, lambda i: (0, 0))
            else:
                spec = pl.BlockSpec(p.shape, lambda i: (0, 0),
                                    pipeline_mode=param_pipeline_mode)
            in_specs.append(spec)

        return pl.pallas_call(
            kernel,
            out_shape=jax.ShapeDtypeStruct((b_pad, out_pad_final), c.dtype),
            grid_spec=pltpu.PrefetchScalarGridSpec(
                num_scalar_prefetch=0,
                grid=(grid,),
                in_specs=in_specs,
                out_specs=pl.BlockSpec((tile_b, out_pad_final), lambda i: (i, 0)),
            ),
            compiler_params=pltpu.CompilerParams(
                dimension_semantics=("parallel",),
                vmem_limit_bytes=vmem_limit),
            cost_estimate=pl.CostEstimate(
                flops=flops, transcendentals=0, bytes_accessed=bytes_accessed),
        )(c_in, *packed)

    try:
        # Constant index_map -> params never change across grid steps; a single
        # buffer avoids doubling their VMEM residency.
        out = run(pl.Buffered(1))
    except Exception:  # pragma: no cover - backend without single-buffer support
        out = run(None)

    return out[:B, :out_channels]


# --------------------------------------------------------------------------- #
# Init + reference
# --------------------------------------------------------------------------- #
def init_params(key, context_dim, out_channels, h_dim=None, dtype=jnp.float32):
    """Parameter init matching ContextProcessor.__init__ shapes.

    Weights are returned as (in_dim, out_dim) (i.e. PyTorch W.T), biases (out_dim,).
    """
    if h_dim is None or h_dim == 0:
        dims = [context_dim, out_channels]
    else:
        if isinstance(h_dim, int):
            h_dim = [h_dim]
        dims = [context_dim] + list(h_dim) + [out_channels]

    weights, biases = [], []
    for i in range(len(dims) - 1):
        in_d, out_d = dims[i], dims[i + 1]
        key, kw, kb = jax.random.split(key, 3)
        bound = 1.0 / (in_d ** 0.5)   # PyTorch Linear default init
        weights.append(jax.random.uniform(kw, (in_d, out_d), dtype, -bound, bound))
        biases.append(jax.random.uniform(kb, (out_d,), dtype, -bound, bound))
    return weights, biases


def reference_forward(c, weights, biases, param_dtype=jnp.float32):
    """Pure-JAX reference. With param_dtype=bf16 it mirrors the kernel's precision
    (bf16 operands, f32 accumulation); with f32 it matches the PyTorch module."""
    x = c.astype(jnp.float32)
    n = len(weights)
    for i, (w, b) in enumerate(zip(weights, biases)):
        x = jnp.dot(x.astype(param_dtype), w.astype(param_dtype),
                    preferred_element_type=jnp.float32)
        x = x + b.astype(param_dtype).astype(jnp.float32)
        if i < n - 1:
            x = jnp.maximum(x, 0.0)
    return x.astype(c.dtype)


# --------------------------------------------------------------------------- #
# Self-test
# --------------------------------------------------------------------------- #
if __name__ == "__main__":
    key = jax.random.PRNGKey(0)

    B = 2
    context_dim = 8
    out_channels = 4

    key, kc = jax.random.split(key)
    c = jax.random.normal(kc, (B, context_dim), jnp.float32)

    # Variant 1: multi-layer MLP (h_dim = [32, 32]).
    key, kp = jax.random.split(key)
    weights, biases = init_params(kp, context_dim, out_channels, h_dim=[32, 32])
    params = prepare_context_processor(weights, biases)          # packed once
    out = jax.block_until_ready(context_processor_forward(c, params))
    assert out.shape == (B, out_channels), out.shape
    ref_bf16 = reference_forward(c, weights, biases, param_dtype=jnp.bfloat16)
    ref_f32 = reference_forward(c, weights, biases)
    assert jnp.allclose(out, ref_bf16, atol=1e-2, rtol=1e-2), "MLP mismatch (bf16 ref)"
    assert jnp.allclose(out, ref_f32, atol=5e-2, rtol=5e-2), "MLP mismatch (f32 ref)"

    # Variant 2: single Linear layer (h_dim = None).
    key, kp1 = jax.random.split(key)
    weights1, biases1 = init_params(kp1, context_dim, out_channels, h_dim=None)
    params1 = prepare_context_processor(weights1, biases1)
    out1 = jax.block_until_ready(context_processor_forward(c, params1))
    assert out1.shape == (B, out_channels), out1.shape
    ref1_bf16 = reference_forward(c, weights1, biases1, param_dtype=jnp.bfloat16)
    ref1_f32 = reference_forward(c, weights1, biases1)
    assert jnp.allclose(out1, ref1_bf16, atol=1e-2, rtol=1e-2), "Linear mismatch (bf16 ref)"
    assert jnp.allclose(out1, ref1_f32, atol=5e-2, rtol=5e-2), "Linear mismatch (f32 ref)"

    # Variant 3: batch large enough to exercise the multi-step (dual-TC) grid and
    # the batch-padding path (B=20 -> b_pad=32, grid=2).
    B3 = 20
    key, kc3 = jax.random.split(key)
    c3 = jax.random.normal(kc3, (B3, context_dim), jnp.float32)
    out3 = jax.block_until_ready(context_processor_forward(c3, params))
    assert out3.shape == (B3, out_channels), out3.shape
    ref3 = reference_forward(c3, weights, biases, param_dtype=jnp.bfloat16)
    assert jnp.allclose(out3, ref3, atol=1e-2, rtol=1e-2), "multi-tile grid mismatch"

    print("KERNEL_OK")
</pallas_src>

<mosaic_0001>
module attributes {stable_mosaic.version = 11 : i64} {
  func.func @kernel(%arg0: i32, %arg1: memref<8x8xf32, #tpu.memory_space<vmem>>, %arg2: memref<16x128xbf16, #tpu.memory_space<vmem>>, %arg3: memref<136x128xbf16, #tpu.memory_space<vmem>>, %arg4: memref<136x128xbf16, #tpu.memory_space<vmem>>, %arg5: memref<8x128xf32, #tpu.memory_space<vmem>>) attributes {dimension_semantics = [#tpu.dimension_semantics<parallel>], iteration_bounds = array<i64: 1>, scalar_prefetch = 0 : i64, scratch_operands = 0 : i64, tpu.core_type = #tpu.core_type<tc>, window_params = [{transform_indices = @transform_0, window_bounds = array<i64: 8, 8>}, {pipeline_mode = #tpu.pipeline_mode<synchronous>, transform_indices = @transform_1, window_bounds = array<i64: 16, 128>}, {pipeline_mode = #tpu.pipeline_mode<synchronous>, transform_indices = @transform_2, window_bounds = array<i64: 136, 128>}, {pipeline_mode = #tpu.pipeline_mode<synchronous>, transform_indices = @transform_3, window_bounds = array<i64: 136, 128>}, {transform_indices = @transform_4, window_bounds = array<i64: 8, 128>}]} {
    %c0 = arith.constant 0 : index
    %c0_0 = arith.constant 0 : index
    %0 = vector.load %arg1[%c0, %c0_0] : memref<8x8xf32, #tpu.memory_space<vmem>>, vector<8x8xf32>
    %c0_1 = arith.constant 0 : index
    %c0_2 = arith.constant 0 : index
    %1 = vector.load %arg2[%c0_1, %c0_2] : memref<16x128xbf16, #tpu.memory_space<vmem>>, vector<8x128xbf16>
    %c8 = arith.constant 8 : index
    %c0_3 = arith.constant 0 : index
    %2 = vector.load %arg2[%c8, %c0_3] : memref<16x128xbf16, #tpu.memory_space<vmem>>, vector<1x128xbf16>
    %3 = arith.truncf %0 : vector<8x8xf32> to vector<8x8xbf16>
    %cst = arith.constant dense<0.000000e+00> : vector<8x128xf32>
    %4 = tpu.matmul %3, %1, %cst {dimension_numbers = #tpu.dot_dimension_numbers<[1], [0], [0], [1], [0, 0, 1, 1], [], []>} : vector<8x8xbf16>, vector<8x128xbf16>, vector<8x128xf32> -> vector<8x128xf32>
    %5 = arith.extf %2 : vector<1x128xbf16> to vector<1x128xf32>
    %6 = vector.broadcast %5 : vector<1x128xf32> to vector<8x128xf32>
    %7 = arith.addf %4, %6 : vector<8x128xf32>
    %cst_4 = arith.constant 0.000000e+00 : f32
    %8 = vector.broadcast %cst_4 : f32 to vector<8x128xf32>
    %9 = arith.maximumf %7, %8 : vector<8x128xf32>
    %c0_5 = arith.constant 0 : index
    %c0_6 = arith.constant 0 : index
    %10 = vector.load %arg3[%c0_5, %c0_6] : memref<136x128xbf16, #tpu.memory_space<vmem>>, vector<128x128xbf16>
    %c128 = arith.constant 128 : index
    %c0_7 = arith.constant 0 : index
    %11 = vector.load %arg3[%c128, %c0_7] : memref<136x128xbf16, #tpu.memory_space<vmem>>, vector<1x128xbf16>
    %12 = arith.truncf %9 : vector<8x128xf32> to vector<8x128xbf16>
    %cst_8 = arith.constant dense<0.000000e+00> : vector<8x128xf32>
    %13 = tpu.matmul %12, %10, %cst_8 {dimension_numbers = #tpu.dot_dimension_numbers<[1], [0], [0], [1], [0, 0, 1, 1], [], []>} : vector<8x128xbf16>, vector<128x128xbf16>, vector<8x128xf32> -> vector<8x128xf32>
    %14 = arith.extf %11 : vector<1x128xbf16> to vector<1x128xf32>
    %15 = vector.broadcast %14 : vector<1x128xf32> to vector<8x128xf32>
    %16 = arith.addf %13, %15 : vector<8x128xf32>
    %cst_9 = arith.constant 0.000000e+00 : f32
    %17 = vector.broadcast %cst_9 : f32 to vector<8x128xf32>
    %18 = arith.maximumf %16, %17 : vector<8x128xf32>
    %c0_10 = arith.constant 0 : index
    %c0_11 = arith.constant 0 : index
    %19 = vector.load %arg4[%c0_10, %c0_11] : memref<136x128xbf16, #tpu.memory_space<vmem>>, vector<128x128xbf16>
    %c128_12 = arith.constant 128 : index
    %c0_13 = arith.constant 0 : index
    %20 = vector.load %arg4[%c128_12, %c0_13] : memref<136x128xbf16, #tpu.memory_space<vmem>>, vector<1x128xbf16>
    %21 = arith.truncf %18 : vector<8x128xf32> to vector<8x128xbf16>
    %cst_14 = arith.constant dense<0.000000e+00> : vector<8x128xf32>
    %22 = tpu.matmul %21, %19, %cst_14 {dimension_numbers = #tpu.dot_dimension_numbers<[1], [0], [0], [1], [0, 0, 1, 1], [], []>} : vector<8x128xbf16>, vector<128x128xbf16>, vector<8x128xf32> -> vector<8x128xf32>
    %23 = arith.extf %20 : vector<1x128xbf16> to vector<1x128xf32>
    %24 = vector.broadcast %23 : vector<1x128xf32> to vector<8x128xf32>
    %25 = arith.addf %22, %24 : vector<8x128xf32>
    %c0_15 = arith.constant 0 : index
    %c0_16 = arith.constant 0 : index
    %26 = vector.load %arg5[%c0_15, %c0_16] : memref<8x128xf32, #tpu.memory_space<vmem>>, vector<8x128xf32>
    tpu.vector_store %arg5[%c0_15, %c0_16], %25 {strides = array<i32>} : memref<8x128xf32, #tpu.memory_space<vmem>>, vector<8x128xf32>,
    return
  }
  func.func @transform_0(%arg0: i32) -> (i32, i32) {
    %c0_i32 = arith.constant 0 : i32
    %c0_i32_0 = arith.constant 0 : i32
    return %arg0, %c0_i32 : i32, i32
  }
  func.func @transform_1(%arg0: i32) -> (i32, i32) {
    %c0_i32 = arith.constant 0 : i32
    %c0_i32_0 = arith.constant 0 : i32
    %c0_i32_1 = arith.constant 0 : i32
    return %c0_i32, %c0_i32_0 : i32, i32
  }
  func.func @transform_2(%arg0: i32) -> (i32, i32) {
    %c0_i32 = arith.constant 0 : i32
    %c0_i32_0 = arith.constant 0 : i32
    %c0_i32_1 = arith.constant 0 : i32
    return %c0_i32, %c0_i32_0 : i32, i32
  }
  func.func @transform_3(%arg0: i32) -> (i32, i32) {
    %c0_i32 = arith.constant 0 : i32
    %c0_i32_0 = arith.constant 0 : i32
    %c0_i32_1 = arith.constant 0 : i32
    return %c0_i32, %c0_i32_0 : i32, i32
  }
  func.func @transform_4(%arg0: i32) -> (i32, i32) {
    %c0_i32 = arith.constant 0 : i32
    %c0_i32_0 = arith.constant 0 : i32
    return %arg0, %c0_i32 : i32, i32
  }
}

module attributes {stable_mosaic.version = 11 : i64} {
  func.func @kernel(%arg0: i32, %arg1: memref<8x8xf32, #tpu.memory_space<vmem>>, %arg2: memref<16x128xbf16, #tpu.memory_space<vmem>>, %arg3: memref<136x128xbf16, #tpu.memory_space<vmem>>, %arg4: memref<136x128xbf16, #tpu.memory_space<vmem>>, %arg5: memref<8x128xf32, #tpu.memory_space<vmem>>) attributes {dimension_semantics = [#tpu.dimension_semantics<parallel>], iteration_bounds = array<i64: 1>, scalar_prefetch = 0 : i64, scratch_operands = 0 : i64, tpu.core_type = #tpu.core_type<tc>, window_params = [{transform_indices = @transform_0, window_bounds = array<i64: 8, 8>}, {pipeline_mode = #tpu.pipeline_mode<synchronous>, transform_indices = @transform_1, window_bounds = array<i64: 16, 128>}, {pipeline_mode = #tpu.pipeline_mode<synchronous>, transform_indices = @transform_2, window_bounds = array<i64: 136, 128>}, {pipeline_mode = #tpu.pipeline_mode<synchronous>, transform_indices = @transform_3, window_bounds = array<i64: 136, 128>}, {transform_indices = @transform_4, window_bounds = array<i64: 8, 128>}]} {
    %c0 = arith.constant 0 : index
    %c0_0 = arith.constant 0 : index
    %0 = vector.load %arg1[%c0, %c0_0] : memref<8x8xf32, #tpu.memory_space<vmem>>, vector<8x8xf32>
    %c0_1 = arith.constant 0 : index
    %c0_2 = arith.constant 0 : index
    %1 = vector.load %arg2[%c0_1, %c0_2] : memref<16x128xbf16, #tpu.memory_space<vmem>>, vector<8x128xbf16>
    %c8 = arith.constant 8 : index
    %c0_3 = arith.constant 0 : index
    %2 = vector.load %arg2[%c8, %c0_3] : memref<16x128xbf16, #tpu.memory_space<vmem>>, vector<1x128xbf16>
    %3 = arith.truncf %0 : vector<8x8xf32> to vector<8x8xbf16>
    %cst = arith.constant dense<0.000000e+00> : vector<8x128xf32>
    %4 = tpu.matmul %3, %1, %cst {dimension_numbers = #tpu.dot_dimension_numbers<[1], [0], [0], [1], [0, 0, 1, 1], [], []>} : vector<8x8xbf16>, vector<8x128xbf16>, vector<8x128xf32> -> vector<8x128xf32>
    %5 = arith.extf %2 : vector<1x128xbf16> to vector<1x128xf32>
    %6 = vector.broadcast %5 : vector<1x128xf32> to vector<8x128xf32>
    %7 = arith.addf %4, %6 : vector<8x128xf32>
    %cst_4 = arith.constant 0.000000e+00 : f32
    %8 = vector.broadcast %cst_4 : f32 to vector<8x128xf32>
    %9 = arith.maximumf %7, %8 : vector<8x128xf32>
    %c0_5 = arith.constant 0 : index
    %c0_6 = arith.constant 0 : index
    %10 = vector.load %arg3[%c0_5, %c0_6] : memref<136x128xbf16, #tpu.memory_space<vmem>>, vector<128x128xbf16>
    %c128 = arith.constant 128 : index
    %c0_7 = arith.constant 0 : index
    %11 = vector.load %arg3[%c128, %c0_7] : memref<136x128xbf16, #tpu.memory_space<vmem>>, vector<1x128xbf16>
    %12 = arith.truncf %9 : vector<8x128xf32> to vector<8x128xbf16>
    %cst_8 = arith.constant dense<0.000000e+00> : vector<8x128xf32>
    %13 = tpu.matmul %12, %10, %cst_8 {dimension_numbers = #tpu.dot_dimension_numbers<[1], [0], [0], [1], [0, 0, 1, 1], [], []>} : vector<8x128xbf16>, vector<128x128xbf16>, vector<8x128xf32> -> vector<8x128xf32>
    %14 = arith.extf %11 : vector<1x128xbf16> to vector<1x128xf32>
    %15 = vector.broadcast %14 : vector<1x128xf32> to vector<8x128xf32>
    %16 = arith.addf %13, %15 : vector<8x128xf32>
    %cst_9 = arith.constant 0.000000e+00 : f32
    %17 = vector.broadcast %cst_9 : f32 to vector<8x128xf32>
    %18 = arith.maximumf %16, %17 : vector<8x128xf32>
    %c0_10 = arith.constant 0 : index
    %c0_11 = arith.constant 0 : index
    %19 = vector.load %arg4[%c0_10, %c0_11] : memref<136x128xbf16, #tpu.memory_space<vmem>>, vector<128x128xbf16>
    %c128_12 = arith.constant 128 : index
    %c0_13 = arith.constant 0 : index
    %20 = vector.load %arg4[%c128_12, %c0_13] : memref<136x128xbf16, #tpu.memory_space<vmem>>, vector<1x128xbf16>
    %21 = arith.truncf %18 : vector<8x128xf32> to vector<8x128xbf16>
    %cst_14 = arith.constant dense<0.000000e+00> : vector<8x128xf32>
    %22 = tpu.matmul %21, %19, %cst_14 {dimension_numbers = #tpu.dot_dimension_numbers<[1], [0], [0], [1], [0, 0, 1, 1], [], []>} : vector<8x128xbf16>, vector<128x128xbf16>, vector<8x128xf32> -> vector<8x128xf32>
    %23 = arith.extf %20 : vector<1x128xbf16> to vector<1x128xf32>
    %24 = vector.broadcast %23 : vector<1x128xf32> to vector<8x128xf32>
    %25 = arith.addf %22, %24 : vector<8x128xf32>
    %c0_15 = arith.constant 0 : index
    %c0_16 = arith.constant 0 : index
    %26 = vector.load %arg5[%c0_15, %c0_16] : memref<8x128xf32, #tpu.memory_space<vmem>>, vector<8x128xf32>
    tpu.vector_store %arg5[%c0_15, %c0_16], %25 {strides = array<i32>} : memref<8x128xf32, #tpu.memory_space<vmem>>, vector<8x128xf32>,
    return
  }
  func.func @transform_0(%arg0: i32) -> (i32, i32) {
    %c0_i32 = arith.constant 0 : i32
    %c0_i32_0 = arith.constant 0 : i32
    return %arg0, %c0_i32 : i32, i32
  }
  func.func @transform_1(%arg0: i32) -> (i32, i32) {
    %c0_i32 = arith.constant 0 : i32
    %c0_i32_0 = arith.constant 0 : i32
    %c0_i32_1 = arith.constant 0 : i32
    return %c0_i32, %c0_i32_0 : i32, i32
  }
  func.func @transform_2(%arg0: i32) -> (i32, i32) {
    %c0_i32 = arith.constant 0 : i32
    %c0_i32_0 = arith.constant 0 : i32
    %c0_i32_1 = arith.constant 0 : i32
    return %c0_i32, %c0_i32_0 : i32, i32
  }
  func.func @transform_3(%arg0: i32) -> (i32, i32) {
    %c0_i32 = arith.constant 0 : i32
    %c0_i32_0 = arith.constant 0 : i32
    %c0_i32_1 = arith.constant 0 : i32
    return %c0_i32, %c0_i32_0 : i32, i32
  }
  func.func @transform_4(%arg0: i32) -> (i32, i32) {
    %c0_i32 = arith.constant 0 : i32
    %c0_i32_0 = arith.constant 0 : i32
    return %arg0, %c0_i32 : i32, i32
  }
}

</mosaic_0001>

<bundles_post_ra>
// kernel: tpu_custom_call.1
= control target key start
LH: loop header
LB: loop body
LE: loop exit
PB: predicated region body
PF: predicated region fallthrough
CT: control target
= control target key end

     0   :  { %9 = vsyncpa [#allocation3], 0  ;;  %s668_s0 = inlined_call_operand.hbm [shape: f32[8,8], index: 0, kind: input, shape index: {}]   ;;  %s669_s1 = inlined_call_operand.hbm [shape: bf16[16,128], index: 1, kind: input, shape index: {}]   ;;  %s670_s2 = inlined_call_operand.hbm [shape: bf16[136,128], index: 2, kind: input, shape index: {}]   ;;  %s671_s3 = inlined_call_operand.hbm [shape: bf16[136,128], index: 3, kind: input, shape index: {}]   ;;  %s672_s4 = inlined_call_operand.hbm [shape: f32[8,128], index: 4, kind: output, shape index: {}]  }
   0x1   :  { %10 = vsyncpa [#allocation6], 0 }
   0x2   :  { %11 = vsyncpa [#allocation9], 0 }
   0x3   :  { %12 = vsyncpa [#allocation4], 0  ;;  %s587_s15 = smov [#allocation5]  }
   0x4   :  { %s28_s16 = sshll.u32 %s587_s15, 4  ;;  %s29_s16 = int_to_ptr.vmem [resolvable:$true] %s28_s16 }
   0x5   :  { %s487_s17 = scalar_lea.vmem %s29_s16, 128  ;;  %p492_p1 = scmp.lt.s32.totalorder %s29_s16, %s29_s16 }
   0x6   :  { %p488_p0 = scmp.ne.s32.totalorder %s29_s16, %s487_s17  ;;  %p493_p2 = scmp.lt.s32.totalorder %s487_s17, %s487_s17 }
   0x8   :  { %p494_p3 = por %p493_p2, %p492_p1 }
   0xa   :  { %p495_p4 = pnand %p494_p3, %p488_p0 }
   0xc   :  { %498 = shalt.err (!%p495_p4)
}
   0xd   :  { %s588_s18 = smov 64   ;;  %s589_s19 = smov 4  }
   0xe   :  { %34 = dma.hbm_to_vmem [thread:$0]  %s669_s1, 128, %s29_s16, [#allocation6], %s588_s18, %s588_s18, %s589_s19  }
   0xf   :  { %s590_s22 = smov [#allocation2]   ;;  %s591_s24 = smov [#allocation7]  }
  0x10   :  { %s19_s23 = sshll.u32 %s590_s22, 4  ;;  %s40_s25 = sshll.u32 %s591_s24, 4  ;;  %s20_s23 = int_to_ptr.vmem [resolvable:$true] %s19_s23  ;;  %s41_s25 = int_to_ptr.vmem [resolvable:$true] %s40_s25 }
  0x11   :  { %s507_s26 = scalar_lea.vmem %s20_s23, 128  ;;  %p512_p6 = scmp.lt.s32.totalorder %s20_s23, %s20_s23 }
  0x12   :  { %p508_p5 = scmp.ne.s32.totalorder %s20_s23, %s507_s26  ;;  %p513_p7 = scmp.lt.s32.totalorder %s507_s26, %s507_s26 }
  0x14   :  { %p514_p8 = por %p513_p7, %p512_p6 }
  0x16   :  { %p515_p9 = pnand %p514_p8, %p508_p5 }
  0x18   :  { %518 = shalt.err (!%p515_p9)
}
  0x19   :  { %22 = dma.hbm_to_vmem [thread:$0]  %s668_s0, 128, %s20_s23, [#allocation3]  }
  0x1a   :  { %s527_s29 = scalar_lea.vmem %s41_s25, 1088  ;;  %p532_p11 = scmp.lt.s32.totalorder %s41_s25, %s41_s25 }
  0x1b   :  { %p528_p10 = scmp.ne.s32.totalorder %s41_s25, %s527_s29  ;;  %p533_p12 = scmp.lt.s32.totalorder %s527_s29, %s527_s29 }
  0x1d   :  { %p534_p13 = por %p533_p12, %p532_p11 }
  0x1f   :  { %p535_p0 = pnand %p534_p13, %p528_p10 }
  0x21   :  { %538 = shalt.err (!%p535_p0)
}
  0x22   :  { %46 = dma.hbm_to_vmem [thread:$0]  %s670_s2, 1088, %s41_s25, [#allocation6], %s588_s18, %s588_s18, %s589_s19  }
  0x23   :  { %s592_s5 = smov [#allocation8]  }
  0x24   :  { %s52_s6 = sshll.u32 %s592_s5, 4  ;;  %s53_s6 = int_to_ptr.vmem [resolvable:$true] %s52_s6 }
  0x25   :  { %s547_s7 = scalar_lea.vmem %s53_s6, 1088  ;;  %p552_p2 = scmp.lt.s32.totalorder %s53_s6, %s53_s6 }
  0x26   :  { %p548_p1 = scmp.ne.s32.totalorder %s53_s6, %s547_s7  ;;  %p553_p3 = scmp.lt.s32.totalorder %s547_s7, %s547_s7 }
  0x28   :  { %p554_p4 = por %p553_p3, %p552_p2 }
  0x2a   :  { %p555_p5 = pnand %p554_p4, %p548_p1 }
  0x2c   :  { %558 = shalt.err (!%p555_p5)
}
  0x2d   :  { %58 = dma.hbm_to_vmem [thread:$0]  %s671_s3, 1088, %s53_s6, [#allocation9], %s588_s18, %s588_s18, %s589_s19  }
  0x2e   :  { %579 = dma.done.wait [#allocation3], 128  }
  0x2f   :  { %580 = vsyncadd [#allocation3], 4294967168 }
  0x30   :  { %581 = dma.done.wait [#allocation6], 1216  }
  0x31   :  { %582 = vsyncadd [#allocation6], 4294966080 }
  0x32   :  { %583 = dma.done.wait [#allocation9], 1088  }
  0x33   :  { %584 = vsyncadd [#allocation9], 4294966208  ;;  %v593_v0 = vmov 0.0   ;;  %vm594_vm0 = vmmov 0   ;;  %vm85_vm1 = vcmask 1043456   ;;  %v72_v2 = vld [vmem:[#allocation2] sm:$0xff]  ;;  %v77_v19 = vlaneseq }
  0x34   :  { %408 = vmatprep.subr.bf16.mxu0 %v593_v0  ;;  %410 = vmatprep.mubr.msk.bf16.mxu0 %vm594_vm0, %v593_v0  ;;  %v73_v1 = vld [vmem:[#allocation5] sm:$0xf]  ;;  %v75_v4 = vpack.c.bf16 %v72_v2, %v72_v2  ;;  %vm81_vm2 = vcmask 64512   ;;  %v464_v6 = vld [vmem:[#allocation7 + $0x30] sm:$0xff]   ;;  %v465_v7 = vld [vmem:[#allocation7 + $0x28] sm:$0xff]   ;;  %s595_s2 = smov [#allocation10]  }
  0x35   :  { %414 = vmatprep.subr.bf16.mxu1 %v593_v0  ;;  %430 = vmatprep.mubr.msk.bf16.mxu1 %vm594_vm0, %v593_v0  ;;  %v87_v3 = vsel %vm85_vm1, %v73_v1, 0  ;;  %v463_v5 = vld [vmem:[#allocation7 + $0x38] sm:$0xff]   ;;  %v466_v8 = vld [vmem:[#allocation7 + $0x20] sm:$0xff]   ;;  %v468_v10 = vld [vmem:[#allocation7 + $0x10] sm:$0xff]   ;;  %v78_v20 = vshrl.u32 %v77_v19, 7  ;;  %s360_s3 = sshll.u32 %s595_s2, 4  ;;  %s361_s3 = int_to_ptr.vmem [resolvable:$true] %s360_s3 }
  0x36   :  { %409 = vmatpush3.bf16.msra.mxu0 %v87_v3  ;;  %415 = vmatpush3.bf16.msra.mxu1 %v463_v5  ;;  %v467_v9 = vld [vmem:[#allocation7 + $0x18] sm:$0xff]   ;;  %v469_v11 = vld [vmem:[#allocation7 + $0x8] sm:$0xff]   ;;  %v470_v12 = vld [vmem:[#allocation7] sm:$0xff]   ;;  %s559_s9 = scalar_lea.vmem %s361_s3, 128  ;;  %p564_p7 = scmp.lt.s32.totalorder %s361_s3, %s361_s3 }
  0x37   :  { %434 = vmatprep.subr.bf16.mxu0 %v593_v0  ;;  %416 = vmatprep.subr.bf16.mxu1 %v593_v0  ;;  %v471_v13 = vld [vmem:[#allocation8 + $0x38] sm:$0xff]   ;;  %v472_v14 = vld [vmem:[#allocation8 + $0x30] sm:$0xff]   ;;  %v473_v15 = vld [vmem:[#allocation8 + $0x28] sm:$0xff]   ;;  %v79_v23 = vsub.s32 0, %v78_v20  ;;  %p560_p6 = scmp.ne.s32.totalorder %s361_s3, %s559_s9  ;;  %p565_p8 = scmp.lt.s32.totalorder %s559_s9, %s559_s9 }
  0x38   :  { %v474_v16 = vld [vmem:[#allocation8 + $0x20] sm:$0xff]   ;;  %v475_v17 = vld [vmem:[#allocation8 + $0x18] sm:$0xff]   ;;  %v476_v18 = vld [vmem:[#allocation8 + $0x10] sm:$0xff]  }
  0x39   :  { %411 = vmatmul.mubr.msk.bf16.vlgmr.msra.gmra.mxu0 %vm81_vm2, %v75_v4  ;;  %v74_v21 = vld [vmem:[#allocation5 + $0x4] sm:$0x1]  ;;  %v477_v32 = vld [vmem:[#allocation8 + $0x8] sm:$0xff]   ;;  %v478_v33 = vld [vmem:[#allocation8] sm:$0xff]   ;;  %p566_p9 = por %p565_p8, %p564_p7 }
  0x3a   :  { %450 = vmatprep.mubr.msk.bf16.mxu0 %vm594_vm0, %v593_v0  ;;  %417 = vmatpush3.bf16.msra.mxu1 %v464_v6  ;;  %v76_v22 = vunpack.c.l.bf16 %v74_v21  ;;  %v146_v34 = vld [vmem:[#allocation7 + $0x40] sm:$0x1]  ;;  %v258_v44 = vld [vmem:[#allocation8 + $0x40] sm:$0x1] }
  0x3b   :  { %418 = vmatprep.subr.bf16.mxu1 %v593_v0  ;;  %435 = vmatpush3.bf16.msra.mxu0 %v471_v13  ;;  %v148_v35 = vunpack.c.l.bf16 %v146_v34  ;;  %v260_v45 = vunpack.c.l.bf16 %v258_v44  ;;  %p567_p10 = pnand %p566_p9, %p560_p6 }
  0x3c   :  { %436 = vmatprep.subr.bf16.mxu0 %v593_v0  ;;  %v80_v24 = vrot.slane %v76_v22, %v79_v23 }
  0x3d   :  { %v152_v36 = vrot.slane %v148_v35, %v79_v23  ;;  %v264_v46 = vrot.slane %v260_v45, %v79_v23 }
  0x3e   :  { %419 = vmatpush3.bf16.msra.mxu1 %v465_v7 }
  0x3f   :  { %420 = vmatprep.subr.bf16.mxu1 %v593_v0  ;;  %437 = vmatpush3.bf16.msra.mxu0 %v472_v14 }
  0x40   :  { %438 = vmatprep.subr.bf16.mxu0 %v593_v0 }
  0x42   :  { %421 = vmatpush3.bf16.msra.mxu1 %v466_v8 }
  0x43   :  { %422 = vmatprep.subr.bf16.mxu1 %v593_v0  ;;  %439 = vmatpush3.bf16.msra.mxu0 %v473_v15 }
  0x44   :  { %440 = vmatprep.subr.bf16.mxu0 %v593_v0 }
  0x46   :  { %423 = vmatpush3.bf16.msra.mxu1 %v467_v9 }
  0x47   :  { %424 = vmatprep.subr.bf16.mxu1 %v593_v0  ;;  %441 = vmatpush3.bf16.msra.mxu0 %v474_v16 }
  0x48   :  { %442 = vmatprep.subr.bf16.mxu0 %v593_v0 }
  0x4a   :  { %425 = vmatpush3.bf16.msra.mxu1 %v468_v10 }
  0x4b   :  { %426 = vmatprep.subr.bf16.mxu1 %v593_v0  ;;  %443 = vmatpush3.bf16.msra.mxu0 %v475_v17 }
  0x4c   :  { %444 = vmatprep.subr.bf16.mxu0 %v593_v0 }
  0x4e   :  { %427 = vmatpush3.bf16.msra.mxu1 %v469_v11 }
  0x4f   :  { %428 = vmatprep.subr.bf16.mxu1 %v593_v0  ;;  %445 = vmatpush3.bf16.msra.mxu0 %v476_v18 }
  0x50   :  { %446 = vmatprep.subr.bf16.mxu0 %v593_v0 }
  0x52   :  { %429 = vmatpush3.bf16.msra.mxu1 %v470_v12 }
  0x53   :  { %447 = vmatpush3.bf16.msra.mxu0 %v477_v32 }
  0x54   :  { %448 = vmatprep.subr.bf16.mxu0 %v593_v0 }
  0x57   :  { %449 = vmatpush3.bf16.msra.mxu0 %v478_v33 }
  0xf9   :  { %v123_v25 = vpop.f32.mrf.mxu0 }
  0xfa   :  { %v124_v26 = vadd.f32 %v123_v25, %v80_v24 }
  0xfb   :  { %v412_v27 = vpop.f32.mrf.mxu0 }
  0xfc   :  { %v129_v28 = vmax.f32 %v124_v26, 0.0 }
  0xfd   :  { %v126_v29 = vpop.f32.mrf.mxu0 }
  0xfe   :  { %v147_v30 = vpack.c.bf16 %v129_v28, %v129_v28 }
  0xff   :  { %v413_v31 = vpop.f32.mrf.mxu0 }
 0x100   :  { %431 = vmatmul.mubr.bf16.vlgmr.msra.gmra.mxu1 %v147_v30 }
 0x1c0   :  { %v235_v37 = vpop.f32.mrf.mxu1 }
 0x1c1   :  { %v236_v38 = vadd.f32 %v235_v37, %v152_v36 }
 0x1c2   :  { %v432_v39 = vpop.f32.mrf.mxu1 }
 0x1c3   :  { %v241_v40 = vmax.f32 %v236_v38, 0.0 }
 0x1c4   :  { %v238_v41 = vpop.f32.mrf.mxu1 }
 0x1c5   :  { %v259_v42 = vpack.c.bf16 %v241_v40, %v241_v40 }
 0x1c6   :  { %v433_v43 = vpop.f32.mrf.mxu1 }
 0x1c7   :  { %451 = vmatmul.mubr.bf16.vlgmr.msra.gmra.mxu0 %v259_v42 }
 0x287   :  { %v347_v47 = vpop.f32.mrf.mxu0 }
 0x288   :  { %v348_v48 = vadd.f32 %v347_v47, %v264_v46 }
 0x289   :  { %v452_v49 = vpop.f32.mrf.mxu0 }
 0x28a   :  { %353 = vst [vmem:[#allocation10] sm:$0xff] %v348_v48 }
 0x28b   :  { %v350_v50 = vpop.f32.mrf.mxu0 }
 0x28c   :  { %570 = shalt.err (!%p567_p10)
}
 0x28d   :  { %363 = dma.vmem_to_hbm [thread:$0]  %s361_s3, 128, %s672_s4, [#allocation4]   ;;  %v453_v51 = vpop.f32.mrf.mxu0 }
 0x28e   :  { %585 = dma.done.wait [#allocation4], 128  }
 0x28f   :  { %586 = vsyncadd [#allocation4], 4294967168 }
 0x290   :  { %367 = vsyncpa [#allocation3], 1 }
 0x291   :  { %368 = vsyncpa [#allocation6], 1 }
 0x292   :  { %369 = vsyncpa [#allocation9], 1 }
 0x293   :  { %370 = vsyncpa [#allocation4], 1 }

// kernel: tpu_custom_call.1
= control target key start
LH: loop header
LB: loop body
LE: loop exit
PB: predicated region body
PF: predicated region fallthrough
CT: control target
= control target key end

     0   :  { %9 = vsyncpa [#allocation3], 0  ;;  %s668_s0 = inlined_call_operand.hbm [shape: f32[8,8], index: 0, kind: input, shape index: {}]   ;;  %s669_s1 = inlined_call_operand.hbm [shape: bf16[16,128], index: 1, kind: input, shape index: {}]   ;;  %s670_s2 = inlined_call_operand.hbm [shape: bf16[136,128], index: 2, kind: input, shape index: {}]   ;;  %s671_s3 = inlined_call_operand.hbm [shape: bf16[136,128], index: 3, kind: input, shape index: {}]   ;;  %s672_s4 = inlined_call_operand.hbm [shape: f32[8,128], index: 4, kind: output, shape index: {}]  }
   0x1   :  { %10 = vsyncpa [#allocation6], 0 }
   0x2   :  { %11 = vsyncpa [#allocation9], 0 }
   0x3   :  { %12 = vsyncpa [#allocation4], 0  ;;  %s587_s15 = smov [#allocation5]  }
   0x4   :  { %s28_s16 = sshll.u32 %s587_s15, 4  ;;  %s29_s16 = int_to_ptr.vmem [resolvable:$true] %s28_s16 }
   0x5   :  { %s487_s17 = scalar_lea.vmem %s29_s16, 128  ;;  %p492_p1 = scmp.lt.s32.totalorder %s29_s16, %s29_s16 }
   0x6   :  { %p488_p0 = scmp.ne.s32.totalorder %s29_s16, %s487_s17  ;;  %p493_p2 = scmp.lt.s32.totalorder %s487_s17, %s487_s17 }
   0x8   :  { %p494_p3 = por %p493_p2, %p492_p1 }
   0xa   :  { %p495_p4 = pnand %p494_p3, %p488_p0 }
   0xc   :  { %498 = shalt.err (!%p495_p4)
}
   0xd   :  { %s588_s18 = smov 64   ;;  %s589_s19 = smov 4  }
   0xe   :  { %34 = dma.hbm_to_vmem [thread:$0]  %s669_s1, 128, %s29_s16, [#allocation6], %s588_s18, %s588_s18, %s589_s19  }
   0xf   :  { %s590_s22 = smov [#allocation2]   ;;  %s591_s24 = smov [#allocation7]  }
  0x10   :  { %s19_s23 = sshll.u32 %s590_s22, 4  ;;  %s40_s25 = sshll.u32 %s591_s24, 4  ;;  %s20_s23 = int_to_ptr.vmem [resolvable:$true] %s19_s23  ;;  %s41_s25 = int_to_ptr.vmem [resolvable:$true] %s40_s25 }
  0x11   :  { %s507_s26 = scalar_lea.vmem %s20_s23, 128  ;;  %p512_p6 = scmp.lt.s32.totalorder %s20_s23, %s20_s23 }
  0x12   :  { %p508_p5 = scmp.ne.s32.totalorder %s20_s23, %s507_s26  ;;  %p513_p7 = scmp.lt.s32.totalorder %s507_s26, %s507_s26 }
  0x14   :  { %p514_p8 = por %p513_p7, %p512_p6 }
  0x16   :  { %p515_p9 = pnand %p514_p8, %p508_p5 }
  0x18   :  { %518 = shalt.err (!%p515_p9)
}
  0x19   :  { %22 = dma.hbm_to_vmem [thread:$0]  %s668_s0, 128, %s20_s23, [#allocation3]  }
  0x1a   :  { %s527_s29 = scalar_lea.vmem %s41_s25, 1088  ;;  %p532_p11 = scmp.lt.s32.totalorder %s41_s25, %s41_s25 }
  0x1b   :  { %p528_p10 = scmp.ne.s32.totalorder %s41_s25, %s527_s29  ;;  %p533_p12 = scmp.lt.s32.totalorder %s527_s29, %s527_s29 }
  0x1d   :  { %p534_p13 = por %p533_p12, %p532_p11 }
  0x1f   :  { %p535_p0 = pnand %p534_p13, %p528_p10 }
  0x21   :  { %538 = shalt.err (!%p535_p0)
}
  0x22   :  { %46 = dma.hbm_to_vmem [thread:$0]  %s670_s2, 1088, %s41_s25, [#allocation6], %s588_s18, %s588_s18, %s589_s19  }
  0x23   :  { %s592_s5 = smov [#allocation8]  }
  0x24   :  { %s52_s6 = sshll.u32 %s592_s5, 4  ;;  %s53_s6 = int_to_ptr.vmem [resolvable:$true] %s52_s6 }
  0x25   :  { %s547_s7 = scalar_lea.vmem %s53_s6, 1088  ;;  %p552_p2 = scmp.lt.s32.totalorder %s53_s6, %s53_s6 }
  0x26   :  { %p548_p1 = scmp.ne.s32.totalorder %s53_s6, %s547_s7  ;;  %p553_p3 = scmp.lt.s32.totalorder %s547_s7, %s547_s7 }
  0x28   :  { %p554_p4 = por %p553_p3, %p552_p2 }
  0x2a   :  { %p555_p5 = pnand %p554_p4, %p548_p1 }
  0x2c   :  { %558 = shalt.err (!%p555_p5)
}
  0x2d   :  { %58 = dma.hbm_to_vmem [thread:$0]  %s671_s3, 1088, %s53_s6, [#allocation9], %s588_s18, %s588_s18, %s589_s19  }
  0x2e   :  { %579 = dma.done.wait [#allocation3], 128  }
  0x2f   :  { %580 = vsyncadd [#allocation3], 4294967168 }
  0x30   :  { %581 = dma.done.wait [#allocation6], 1216  }
  0x31   :  { %582 = vsyncadd [#allocation6], 4294966080 }
  0x32   :  { %583 = dma.done.wait [#allocation9], 1088  }
  0x33   :  { %584 = vsyncadd [#allocation9], 4294966208  ;;  %v593_v0 = vmov 0.0   ;;  %vm594_vm0 = vmmov 0   ;;  %vm85_vm1 = vcmask 1043456   ;;  %v72_v2 = vld [vmem:[#allocation2] sm:$0xff]  ;;  %v77_v19 = vlaneseq }
  0x34   :  { %408 = vmatprep.subr.bf16.mxu0 %v593_v0  ;;  %410 = vmatprep.mubr.msk.bf16.mxu0 %vm594_vm0, %v593_v0  ;;  %v73_v1 = vld [vmem:[#allocation5] sm:$0xf]  ;;  %v75_v4 = vpack.c.bf16 %v72_v2, %v72_v2  ;;  %vm81_vm2 = vcmask 64512   ;;  %v464_v6 = vld [vmem:[#allocation7 + $0x30] sm:$0xff]   ;;  %v465_v7 = vld [vmem:[#allocation7 + $0x28] sm:$0xff]   ;;  %s595_s2 = smov [#allocation10]  }
  0x35   :  { %414 = vmatprep.subr.bf16.mxu1 %v593_v0  ;;  %430 = vmatprep.mubr.msk.bf16.mxu1 %vm594_vm0, %v593_v0  ;;  %v87_v3 = vsel %vm85_vm1, %v73_v1, 0  ;;  %v463_v5 = vld [vmem:[#allocation7 + $0x38] sm:$0xff]   ;;  %v466_v8 = vld [vmem:[#allocation7 + $0x20] sm:$0xff]   ;;  %v468_v10 = vld [vmem:[#allocation7 + $0x10] sm:$0xff]   ;;  %v78_v20 = vshrl.u32 %v77_v19, 7  ;;  %s360_s3 = sshll.u32 %s595_s2, 4  ;;  %s361_s3 = int_to_ptr.vmem [resolvable:$true] %s360_s3 }
  0x36   :  { %409 = vmatpush3.bf16.msra.mxu0 %v87_v3  ;;  %415 = vmatpush3.bf16.msra.mxu1 %v463_v5  ;;  %v467_v9 = vld [vmem:[#allocation7 + $0x18] sm:$0xff]   ;;  %v469_v11 = vld [vmem:[#allocation7 + $0x8] sm:$0xff]   ;;  %v470_v12 = vld [vmem:[#allocation7] sm:$0xff]   ;;  %s559_s9 = scalar_lea.vmem %s361_s3, 128  ;;  %p564_p7 = scmp.lt.s32.totalorder %s361_s3, %s361_s3 }
  0x37   :  { %434 = vmatprep.subr.bf16.mxu0 %v593_v0  ;;  %416 = vmatprep.subr.bf16.mxu1 %v593_v0  ;;  %v471_v13 = vld [vmem:[#allocation8 + $0x38] sm:$0xff]   ;;  %v472_v14 = vld [vmem:[#allocation8 + $0x30] sm:$0xff]   ;;  %v473_v15 = vld [vmem:[#allocation8 + $0x28] sm:$0xff]   ;;  %v79_v23 = vsub.s32 0, %v78_v20  ;;  %p560_p6 = scmp.ne.s32.totalorder %s361_s3, %s559_s9  ;;  %p565_p8 = scmp.lt.s32.totalorder %s559_s9, %s559_s9 }
  0x38   :  { %v474_v16 = vld [vmem:[#allocation8 + $0x20] sm:$0xff]   ;;  %v475_v17 = vld [vmem:[#allocation8 + $0x18] sm:$0xff]   ;;  %v476_v18 = vld [vmem:[#allocation8 + $0x10] sm:$0xff]  }
  0x39   :  { %411 = vmatmul.mubr.msk.bf16.vlgmr.msra.gmra.mxu0 %vm81_vm2, %v75_v4  ;;  %v74_v21 = vld [vmem:[#allocation5 + $0x4] sm:$0x1]  ;;  %v477_v32 = vld [vmem:[#allocation8 + $0x8] sm:$0xff]   ;;  %v478_v33 = vld [vmem:[#allocation8] sm:$0xff]   ;;  %p566_p9 = por %p565_p8, %p564_p7 }
  0x3a   :  { %450 = vmatprep.mubr.msk.bf16.mxu0 %vm594_vm0, %v593_v0  ;;  %417 = vmatpush3.bf16.msra.mxu1 %v464_v6  ;;  %v76_v22 = vunpack.c.l.bf16 %v74_v21  ;;  %v146_v34 = vld [vmem:[#allocation7 + $0x40] sm:$0x1]  ;;  %v258_v44 = vld [vmem:[#allocation8 + $0x40] sm:$0x1] }
  0x3b   :  { %418 = vmatprep.subr.bf16.mxu1 %v593_v0  ;;  %435 = vmatpush3.bf16.msra.mxu0 %v471_v13  ;;  %v148_v35 = vunpack.c.l.bf16 %v146_v34  ;;  %v260_v45 = vunpack.c.l.bf16 %v258_v44  ;;  %p567_p10 = pnand %p566_p9, %p560_p6 }
  0x3c   :  { %436 = vmatprep.subr.bf16.mxu0 %v593_v0  ;;  %v80_v24 = vrot.slane %v76_v22, %v79_v23 }
  0x3d   :  { %v152_v36 = vrot.slane %v148_v35, %v79_v23  ;;  %v264_v46 = vrot.slane %v260_v45, %v79_v23 }
  0x3e   :  { %419 = vmatpush3.bf16.msra.mxu1 %v465_v7 }
  0x3f   :  { %420 = vmatprep.subr.bf16.mxu1 %v593_v0  ;;  %437 = vmatpush3.bf16.msra.mxu0 %v472_v14 }
  0x40   :  { %438 = vmatprep.subr.bf16.mxu0 %v593_v0 }
  0x42   :  { %421 = vmatpush3.bf16.msra.mxu1 %v466_v8 }
  0x43   :  { %422 = vmatprep.subr.bf16.mxu1 %v593_v0  ;;  %439 = vmatpush3.bf16.msra.mxu0 %v473_v15 }
  0x44   :  { %440 = vmatprep.subr.bf16.mxu0 %v593_v0 }
  0x46   :  { %423 = vmatpush3.bf16.msra.mxu1 %v467_v9 }
  0x47   :  { %424 = vmatprep.subr.bf16.mxu1 %v593_v0  ;;  %441 = vmatpush3.bf16.msra.mxu0 %v474_v16 }
  0x48   :  { %442 = vmatprep.subr.bf16.mxu0 %v593_v0 }
  0x4a   :  { %425 = vmatpush3.bf16.msra.mxu1 %v468_v10 }
  0x4b   :  { %426 = vmatprep.subr.bf16.mxu1 %v593_v0  ;;  %443 = vmatpush3.bf16.msra.mxu0 %v475_v17 }
  0x4c   :  { %444 = vmatprep.subr.bf16.mxu0 %v593_v0 }
  0x4e   :  { %427 = vmatpush3.bf16.msra.mxu1 %v469_v11 }
  0x4f   :  { %428 = vmatprep.subr.bf16.mxu1 %v593_v0  ;;  %445 = vmatpush3.bf16.msra.mxu0 %v476_v18 }
  0x50   :  { %446 = vmatprep.subr.bf16.mxu0 %v593_v0 }
  0x52   :  { %429 = vmatpush3.bf16.msra.mxu1 %v470_v12 }
  0x53   :  { %447 = vmatpush3.bf16.msra.mxu0 %v477_v32 }
  0x54   :  { %448 = vmatprep.subr.bf16.mxu0 %v593_v0 }
  0x57   :  { %449 = vmatpush3.bf16.msra.mxu0 %v478_v33 }
  0xf9   :  { %v123_v25 = vpop.f32.mrf.mxu0 }
  0xfa   :  { %v124_v26 = vadd.f32 %v123_v25, %v80_v24 }
  0xfb   :  { %v412_v27 = vpop.f32.mrf.mxu0 }
  0xfc   :  { %v129_v28 = vmax.f32 %v124_v26, 0.0 }
  0xfd   :  { %v126_v29 = vpop.f32.mrf.mxu0 }
  0xfe   :  { %v147_v30 = vpack.c.bf16 %v129_v28, %v129_v28 }
  0xff   :  { %v413_v31 = vpop.f32.mrf.mxu0 }
 0x100   :  { %431 = vmatmul.mubr.bf16.vlgmr.msra.gmra.mxu1 %v147_v30 }
 0x1c0   :  { %v235_v37 = vpop.f32.mrf.mxu1 }
 0x1c1   :  { %v236_v38 = vadd.f32 %v235_v37, %v152_v36 }
 0x1c2   :  { %v432_v39 = vpop.f32.mrf.mxu1 }
 0x1c3   :  { %v241_v40 = vmax.f32 %v236_v38, 0.0 }
 0x1c4   :  { %v238_v41 = vpop.f32.mrf.mxu1 }
 0x1c5   :  { %v259_v42 = vpack.c.bf16 %v241_v40, %v241_v40 }
 0x1c6   :  { %v433_v43 = vpop.f32.mrf.mxu1 }
 0x1c7   :  { %451 = vmatmul.mubr.bf16.vlgmr.msra.gmra.mxu0 %v259_v42 }
 0x287   :  { %v347_v47 = vpop.f32.mrf.mxu0 }
 0x288   :  { %v348_v48 = vadd.f32 %v347_v47, %v264_v46 }
 0x289   :  { %v452_v49 = vpop.f32.mrf.mxu0 }
 0x28a   :  { %353 = vst [vmem:[#allocation10] sm:$0xff] %v348_v48 }
 0x28b   :  { %v350_v50 = vpop.f32.mrf.mxu0 }
 0x28c   :  { %570 = shalt.err (!%p567_p10)
}
 0x28d   :  { %363 = dma.vmem_to_hbm [thread:$0]  %s361_s3, 128, %s672_s4, [#allocation4]   ;;  %v453_v51 = vpop.f32.mrf.mxu0 }
 0x28e   :  { %585 = dma.done.wait [#allocation4], 128  }
 0x28f   :  { %586 = vsyncadd [#allocation4], 4294967168 }
 0x290   :  { %367 = vsyncpa [#allocation3], 1 }
 0x291   :  { %368 = vsyncpa [#allocation6], 1 }
 0x292   :  { %369 = vsyncpa [#allocation9], 1 }
 0x293   :  { %370 = vsyncpa [#allocation4], 1 }

</bundles_post_ra>
